<compile_context>
chip_gen: v7x
topology: tpu7x:2x2x1
jax: 0.10.0
libtpu: 0.0.40
codegen_flags: <defaults>
</compile_context>

<pallas_src>
import jax
import jax.numpy as jnp
from jax import lax
from jax.experimental import pallas as pl
from jax.experimental.pallas import tpu as pltpu


def _round_up(x, m):
    return ((x + m - 1) // m) * m


def mlp_kernel(x_ref, w1_ref, b1_ref, w2_ref, b2_ref, o_ref, acc_ref, h_ref):
    n = pl.program_id(1)
    k = pl.program_id(2)

    @pl.when(k == 0)
    def _init():
        acc_ref[...] = jnp.zeros_like(acc_ref)

    # fc1 slice for this K tile of dim_mid: h_k = relu(x @ W1_k.T + b1_k).
    # Computed once per M tile (at n == 0) and cached in VMEM for every
    # remaining N tile.  w1_ref is (TK, dim_in) in PyTorch [out, in] layout,
    # so both matmuls contract on the last dim (MXU-native transposed RHS).
    @pl.when(n == 0)
    def _fc1():
        h = lax.dot_general(
            x_ref[...], w1_ref[...],
            dimension_numbers=(((1,), (1,)), ((), ())),
            preferred_element_type=jnp.float32)
        h = jnp.maximum(h + b1_ref[k].astype(jnp.float32), 0.0)
        h_ref[k] = h.astype(h_ref.dtype)

    # Partial fc2: acc += h_k @ W2[n_tile, k_tile].T   (w2_ref is (TN, TK)).
    acc_ref[...] += lax.dot_general(
        h_ref[k], w2_ref[...],
        dimension_numbers=(((1,), (1,)), ((), ())),
        preferred_element_type=jnp.float32)

    @pl.when(k == pl.num_programs(2) - 1)
    def _finalize():
        o_ref[...] = (acc_ref[...] + b2_ref[n].astype(jnp.float32)
                      ).astype(o_ref.dtype)


def mlp_forward(x, w1, b1, w2, b2, *, tm=256, tn=256, tk=256,
                compute_dtype=jnp.bfloat16):
    """Fused MLP forward pass.

    x:  [B, dim_in]
    w1: [dim_mid, dim_in], b1: [dim_mid]   (PyTorch nn.Linear layout)
    w2: [dim_out, dim_mid], b2: [dim_out]
    """
    B, dim_in = x.shape
    dim_mid = w1.shape[0]
    dim_out = w2.shape[0]
    out_dtype = x.dtype
    if compute_dtype is None:
        compute_dtype = x.dtype
    isz_c = jnp.dtype(compute_dtype).itemsize
    out_isz = jnp.dtype(out_dtype).itemsize

    # MXU/layout-aligned tile sizes, clamped to the (padded) problem size.
    TM = min(tm, _round_up(B, 8))
    TN = min(tn, _round_up(dim_out, 128))
    TK = min(tk, _round_up(dim_mid, 128))
    Dinp = _round_up(dim_in, 128)

    # VMEM accounting: per-spec buffer_count * block bytes + scratch bytes.
    def vmem_estimate(TM_, TN_, TK_):
        dmidp = _round_up(dim_mid, TK_)
        doutp = _round_up(dim_out, TN_)
        buffers = (2 * TM_ * Dinp * isz_c        # x (double-buffered)
                   + 2 * TK_ * Dinp * isz_c      # w1
                   + 2 * dmidp * 4               # b1 (resident)
                   + 2 * TN_ * TK_ * isz_c       # w2
                   + 2 * doutp * 4               # b2 (resident)
                   + 2 * TM_ * TN_ * out_isz)    # out
        scratch = TM_ * TN_ * 4 + TM_ * dmidp * isz_c   # acc + h_cache
        return buffers + scratch

    try:
        vmem_cap = int(pltpu.get_tpu_info().vmem_capacity_bytes)
    except Exception:
        vmem_cap = 64 * 1024 * 1024   # v7x per-TensorCore capacity (safe floor)
    budget = vmem_cap - (16 << 20)    # headroom for compiler scratch etc.

    # Shrink tiles if the full-dim_in x/w1 blocks + h_cache exceed the budget
    # (matters for very wide dim_in / dim_mid, especially on v7x's 64 MiB).
    for _ in range(12):
        if vmem_estimate(TM, TN, TK) <= budget:
            break
        if TK > 128:
            TK = _round_up(TK // 2, 128)
        elif TM > 128:
            TM = max(8, _round_up(TM // 2, 8))
        elif TN > 128:
            TN = _round_up(TN // 2, 128)
        else:
            break

    Bp = _round_up(B, TM)
    Dmidp = _round_up(dim_mid, TK)
    Doutp = _round_up(dim_out, TN)
    Kt = Dmidp // TK
    Nt = Doutp // TN

    # bf16 matmul operands (MXU-native); biases stay f32 for exact adds.
    x_c = x.astype(compute_dtype)
    w1_c = w1.astype(compute_dtype)
    w2_c = w2.astype(compute_dtype)

    # Zero-pad to tile boundaries (exact: relu(0)=0, zero w2 columns; padded
    # batch/dim_out rows/cols sliced off below).
    if (Bp, Dinp) != (B, dim_in):
        x_c = jnp.pad(x_c, ((0, Bp - B), (0, Dinp - dim_in)))
    if (Dmidp, Dinp) != (dim_mid, dim_in):
        w1_c = jnp.pad(w1_c, ((0, Dmidp - dim_mid), (0, Dinp - dim_in)))
    if (Doutp, Dmidp) != (dim_out, dim_mid):
        w2_c = jnp.pad(w2_c, ((0, Doutp - dim_out), (0, Dmidp - dim_mid)))
    b1_r = jnp.pad(b1.astype(jnp.float32),
                   (0, Dmidp - dim_mid)).reshape(Kt, 1, TK)
    b2_r = jnp.pad(b2.astype(jnp.float32),
                   (0, Doutp - dim_out)).reshape(Nt, 1, TN)

    grid = (Bp // TM, Nt, Kt)

    cost = pl.CostEstimate(
        flops=2 * Bp * Dinp * Dmidp + 2 * Bp * Dmidp * Doutp,
        transcendentals=0,
        bytes_accessed=int(
            Bp * Dinp * isz_c                          # x read once
            + (Bp // TM) * Dmidp * Dinp * isz_c        # w1 once per M tile
            + (Bp // TM) * Doutp * Dmidp * isz_c       # w2 once per M tile
            + (Dmidp + Doutp) * 4                      # biases
            + Bp * Doutp * out_isz))                   # output write

    vmem_limit = int(min(max(vmem_estimate(TM, TN, TK) + (4 << 20),
                             16 * 1024 * 1024),
                         vmem_cap - (8 << 20)))

    out_padded = pl.pallas_call(
        mlp_kernel,
        out_shape=jax.ShapeDtypeStruct((Bp, Doutp), out_dtype),
        grid_spec=pltpu.PrefetchScalarGridSpec(
            num_scalar_prefetch=0,
            grid=grid,
            in_specs=[
                # x: resident across n and k (block index changes with m only).
                pl.BlockSpec((TM, Dinp), lambda m, n, k: (m, 0)),
                # w1: streamed over k only while n == 0; constant block index
                # for n > 0 so it is never re-fetched from HBM (data unused).
                pl.BlockSpec((TK, Dinp),
                             lambda m, n, k: (jnp.where(n == 0, k, 0), 0)),
                # b1: fully VMEM-resident, indexed by k inside the kernel.
                pl.BlockSpec((Kt, 1, TK), lambda m, n, k: (0, 0, 0)),
                # w2 tile (PyTorch [out, in] layout).
                pl.BlockSpec((TN, TK), lambda m, n, k: (n, k)),
                # b2: fully VMEM-resident, indexed by n inside the kernel.
                pl.BlockSpec((Nt, 1, TN), lambda m, n, k: (0, 0, 0)),
            ],
            out_specs=pl.BlockSpec((TM, TN), lambda m, n, k: (m, n)),
            scratch_shapes=[
                pltpu.VMEM((TM, TN), jnp.float32),        # fc2 f32 accumulator
                pltpu.VMEM((Kt, TM, TK), compute_dtype),  # cached fc1 output
            ],
        ),
        compiler_params=pltpu.CompilerParams(
            # N is order-dependent (n == 0 fills h_cache) -> "arbitrary";
            # megacore sharding (v7x) happens on the M axis.
            dimension_semantics=("parallel", "arbitrary", "arbitrary"),
            vmem_limit_bytes=vmem_limit),
        cost_estimate=cost,
    )(x_c, w1_c, b1_r, w2_c, b2_r)

    if (Bp, Doutp) != (B, dim_out):
        return out_padded[:B, :dim_out]
    return out_padded


def init_params(key, dim_in, dim_mid, dim_out, dtype=jnp.float32):
    # Mimics PyTorch nn.Linear default init: U(-1/sqrt(fan_in), 1/sqrt(fan_in)).
    k1, k2, k3, k4 = jax.random.split(key, 4)
    bound1 = 1.0 / jnp.sqrt(dim_in)
    bound2 = 1.0 / jnp.sqrt(dim_mid)
    w1 = jax.random.uniform(k1, (dim_mid, dim_in), dtype, -bound1, bound1)
    b1 = jax.random.uniform(k2, (dim_mid,), dtype, -bound1, bound1)
    w2 = jax.random.uniform(k3, (dim_out, dim_mid), dtype, -bound2, bound2)
    b2 = jax.random.uniform(k4, (dim_out,), dtype, -bound2, bound2)
    return w1, b1, w2, b2


def mlp_reference_f32(x, w1, b1, w2, b2):
    return jnp.maximum(x @ w1.T + b1, 0.0) @ w2.T + b2


def mlp_reference_lowp(x, w1, b1, w2, b2, compute_dtype=jnp.bfloat16):
    # Mirrors the kernel's quantization points: bf16 matmul operands,
    # f32 accumulation, f32 bias adds, bf16 cached activation.
    xb, w1b, w2b = (t.astype(compute_dtype) for t in (x, w1, w2))
    h = jnp.maximum(
        jnp.dot(xb, w1b.T, preferred_element_type=jnp.float32)
        + b1.astype(jnp.float32), 0.0)
    o = (jnp.dot(h.astype(compute_dtype), w2b.T,
                 preferred_element_type=jnp.float32)
         + b2.astype(jnp.float32))
    return o.astype(x.dtype)


def _check(out, x, w1, b1, w2, b2):
    ref_lp = mlp_reference_lowp(x, w1, b1, w2, b2)
    ref_f32 = mlp_reference_f32(x, w1, b1, w2, b2)
    assert jnp.allclose(out, ref_lp, atol=1e-3, rtol=1e-3), \
        float(jnp.max(jnp.abs(out - ref_lp)))
    assert jnp.allclose(out, ref_f32, atol=1e-1, rtol=1e-1), \
        float(jnp.max(jnp.abs(out - ref_f32)))


if __name__ == "__main__":
    key = jax.random.PRNGKey(0)
    kx1, kp1, kx2, kp2, kx3, kp3 = jax.random.split(key, 6)

    # Test 1: MXU-aligned shapes; small tiles force a real (M, N, K) = (2, 2, 2)
    # grid, exercising the accumulator pattern, fc1 cache reuse across N tiles,
    # and the n==0-gated w1 streaming.
    B, dim_in, dim_mid, dim_out = 16, 128, 256, 256
    x = jax.random.normal(kx1, (B, dim_in), jnp.float32)
    w1, b1, w2, b2 = init_params(kp1, dim_in, dim_mid, dim_out)
    out = mlp_forward(x, w1, b1, w2, b2, tm=8, tn=128, tk=128)
    jax.block_until_ready(out)
    assert out.shape == (B, dim_out)
    _check(out, x, w1, b1, w2, b2)

    # Test 2: unaligned shapes exercise the zero-padding path (grid (1,1,1)).
    B2, di2, dm2, do2 = 8, 32, 64, 16
    x2 = jax.random.normal(kx2, (B2, di2), jnp.float32)
    w1b, b1b, w2b, b2b = init_params(kp2, di2, dm2, do2)
    out2 = mlp_forward(x2, w1b, b1b, w2b, b2b)
    jax.block_until_ready(out2)
    assert out2.shape == (B2, do2)
    _check(out2, x2, w1b, b1b, w2b, b2b)

    # Test 3: default tiles with dim_out padding and N-tile reuse of the cache.
    B3, di3, dm3, do3 = 128, 256, 512, 384
    x3 = jax.random.normal(kx3, (B3, di3), jnp.float32)
    w1c, b1c, w2c, b2c = init_params(kp3, di3, dm3, do3)
    out3 = mlp_forward(x3, w1c, b1c, w2c, b2c)
    jax.block_until_ready(out3)
    assert out3.shape == (B3, do3)
    _check(out3, x3, w1c, b1c, w2c, b2c)

    print("KERNEL_OK")
</pallas_src>

<mosaic_0001>
module attributes {stable_mosaic.version = 11 : i64} {
  func.func @mlp_kernel(%arg0: i32, %arg1: i32, %arg2: i32, %arg3: memref<8x128xbf16, #tpu.memory_space<vmem>>, %arg4: memref<128x128xbf16, #tpu.memory_space<vmem>>, %arg5: memref<2x1x128xf32, #tpu.memory_space<vmem>>, %arg6: memref<128x128xbf16, #tpu.memory_space<vmem>>, %arg7: memref<2x1x128xf32, #tpu.memory_space<vmem>>, %arg8: memref<8x128xf32, #tpu.memory_space<vmem>>, %arg9: memref<8x128xf32, #tpu.memory_space<vmem>>, %arg10: memref<2x8x128xbf16, #tpu.memory_space<vmem>>) attributes {dimension_semantics = [#tpu.dimension_semantics<parallel>, #tpu.dimension_semantics<arbitrary>, #tpu.dimension_semantics<arbitrary>], iteration_bounds = array<i64: 2, 2, 2>, scalar_prefetch = 0 : i64, scratch_operands = 2 : i64, tpu.core_type = #tpu.core_type<tc>, window_params = [{transform_indices = @transform_0, window_bounds = array<i64: 8, 128>}, {transform_indices = @transform_1, window_bounds = array<i64: 128, 128>}, {pipeline_mode = #tpu.pipeline_mode<synchronous>, transform_indices = @transform_2, window_bounds = array<i64: 2, 1, 128>}, {transform_indices = @transform_3, window_bounds = array<i64: 128, 128>}, {pipeline_mode = #tpu.pipeline_mode<synchronous>, transform_indices = @transform_4, window_bounds = array<i64: 2, 1, 128>}, {transform_indices = @transform_5, window_bounds = array<i64: 8, 128>}]} {
    %c0_i32 = arith.constant 0 : i32
    %0 = arith.cmpi eq, %arg2, %c0_i32 : i32
    %1 = arith.extui %0 : i1 to i32
    %c0_i32_0 = arith.constant 0 : i32
    %2 = arith.cmpi ne, %1, %c0_i32_0 : i32
    scf.if %2 {
      %cst_11 = arith.constant 0.000000e+00 : f32
      %17 = vector.broadcast %cst_11 : f32 to vector<8x128xf32>
      %c0_12 = arith.constant 0 : index
      %c0_13 = arith.constant 0 : index
      %18 = vector.load %arg9[%c0_12, %c0_13] : memref<8x128xf32, #tpu.memory_space<vmem>>, vector<8x128xf32>
      tpu.vector_store %arg9[%c0_12, %c0_13], %17 {strides = array<i32>} : memref<8x128xf32, #tpu.memory_space<vmem>>, vector<8x128xf32>,
    } else {
    }
    %c0_i32_1 = arith.constant 0 : i32
    %3 = arith.cmpi eq, %arg1, %c0_i32_1 : i32
    %4 = arith.extui %3 : i1 to i32
    %c0_i32_2 = arith.constant 0 : i32
    %5 = arith.cmpi ne, %4, %c0_i32_2 : i32
    scf.if %5 {
      %c0_11 = arith.constant 0 : index
      %c0_12 = arith.constant 0 : index
      %17 = vector.load %arg3[%c0_11, %c0_12] : memref<8x128xbf16, #tpu.memory_space<vmem>>, vector<8x128xbf16>
      %c0_13 = arith.constant 0 : index
      %c0_14 = arith.constant 0 : index
      %18 = vector.load %arg4[%c0_13, %c0_14] : memref<128x128xbf16, #tpu.memory_space<vmem>>, vector<128x128xbf16>
      %cst_15 = arith.constant dense<0.000000e+00> : vector<8x128xf32>
      %19 = tpu.matmul %17, %18, %cst_15 {dimension_numbers = #tpu.dot_dimension_numbers<[1], [1], [0], [0], [0, 0, 1, 0], [], []>} : vector<8x128xbf16>, vector<128x128xbf16>, vector<8x128xf32> -> vector<8x128xf32>
      %20 = arith.index_cast %arg2 : i32 to index
      %c0_16 = arith.constant 0 : index
      %c0_17 = arith.constant 0 : index
      %21 = vector.load %arg5[%20, %c0_16, %c0_17] : memref<2x1x128xf32, #tpu.memory_space<vmem>>, vector<1x1x128xf32>
      %22 = vector.shape_cast %21 : vector<1x1x128xf32> to vector<1x128xf32>
      %23 = vector.broadcast %22 : vector<1x128xf32> to vector<8x128xf32>
      %24 = arith.addf %19, %23 : vector<8x128xf32>
      %cst_18 = arith.constant 0.000000e+00 : f32
      %25 = vector.broadcast %cst_18 : f32 to vector<8x128xf32>
      %26 = arith.maximumf %24, %25 : vector<8x128xf32>
      %27 = arith.truncf %26 : vector<8x128xf32> to vector<8x128xbf16>
      %28 = arith.index_cast %arg2 : i32 to index
      %c0_19 = arith.constant 0 : index
      %c0_20 = arith.constant 0 : index
      %29 = vector.load %arg10[%28, %c0_19, %c0_20] : memref<2x8x128xbf16, #tpu.memory_space<vmem>>, vector<1x8x128xbf16>
      %30 = vector.shape_cast %29 : vector<1x8x128xbf16> to vector<8x128xbf16>
      %31 = vector.shape_cast %27 : vector<8x128xbf16> to vector<1x8x128xbf16>
      tpu.vector_store %arg10[%28, %c0_19, %c0_20], %31 {strides = array<i32>} : memref<2x8x128xbf16, #tpu.memory_space<vmem>>, vector<1x8x128xbf16>,
    } else {
    }
    %c0 = arith.constant 0 : index
    %c0_3 = arith.constant 0 : index
    %6 = vector.load %arg9[%c0, %c0_3] : memref<8x128xf32, #tpu.memory_space<vmem>>, vector<8x128xf32>
    %7 = arith.index_cast %arg2 : i32 to index
    %c0_4 = arith.constant 0 : index
    %c0_5 = arith.constant 0 : index
    %8 = vector.load %arg10[%7, %c0_4, %c0_5] : memref<2x8x128xbf16, #tpu.memory_space<vmem>>, vector<1x8x128xbf16>
    %9 = vector.shape_cast %8 : vector<1x8x128xbf16> to vector<8x128xbf16>
    %c0_6 = arith.constant 0 : index
    %c0_7 = arith.constant 0 : index
    %10 = vector.load %arg6[%c0_6, %c0_7] : memref<128x128xbf16, #tpu.memory_space<vmem>>, vector<128x128xbf16>
    %cst = arith.constant dense<0.000000e+00> : vector<8x128xf32>
    %11 = tpu.matmul %9, %10, %cst {dimension_numbers = #tpu.dot_dimension_numbers<[1], [1], [0], [0], [0, 0, 1, 0], [], []>} : vector<8x128xbf16>, vector<128x128xbf16>, vector<8x128xf32> -> vector<8x128xf32>
    %12 = arith.addf %6, %11 : vector<8x128xf32>
    %c0_8 = arith.constant 0 : index
    %c0_9 = arith.constant 0 : index
    %13 = vector.load %arg9[%c0_8, %c0_9] : memref<8x128xf32, #tpu.memory_space<vmem>>, vector<8x128xf32>
    tpu.vector_store %arg9[%c0_8, %c0_9], %12 {strides = array<i32>} : memref<8x128xf32, #tpu.memory_space<vmem>>, vector<8x128xf32>,
    %c1_i32 = arith.constant 1 : i32
    %14 = arith.cmpi eq, %arg2, %c1_i32 : i32
    %15 = arith.extui %14 : i1 to i32
    %c0_i32_10 = arith.constant 0 : i32
    %16 = arith.cmpi ne, %15, %c0_i32_10 : i32
    scf.if %16 {
      %c0_11 = arith.constant 0 : index
      %c0_12 = arith.constant 0 : index
      %17 = vector.load %arg9[%c0_11, %c0_12] : memref<8x128xf32, #tpu.memory_space<vmem>>, vector<8x128xf32>
      %18 = arith.index_cast %arg1 : i32 to index
      %c0_13 = arith.constant 0 : index
      %c0_14 = arith.constant 0 : index
      %19 = vector.load %arg7[%18, %c0_13, %c0_14] : memref<2x1x128xf32, #tpu.memory_space<vmem>>, vector<1x1x128xf32>
      %20 = vector.shape_cast %19 : vector<1x1x128xf32> to vector<1x128xf32>
      %21 = vector.broadcast %20 : vector<1x128xf32> to vector<8x128xf32>
      %22 = arith.addf %17, %21 : vector<8x128xf32>
      %c0_15 = arith.constant 0 : index
      %c0_16 = arith.constant 0 : index
      %23 = vector.load %arg8[%c0_15, %c0_16] : memref<8x128xf32, #tpu.memory_space<vmem>>, vector<8x128xf32>
      tpu.vector_store %arg8[%c0_15, %c0_16], %22 {strides = array<i32>} : memref<8x128xf32, #tpu.memory_space<vmem>>, vector<8x128xf32>,
    } else {
    }
    return
  }
  func.func @transform_0(%arg0: i32, %arg1: i32, %arg2: i32) -> (i32, i32) {
    %c0_i32 = arith.constant 0 : i32
    %c0_i32_0 = arith.constant 0 : i32
    return %arg0, %c0_i32 : i32, i32
  }
  func.func @transform_1(%arg0: i32, %arg1: i32, %arg2: i32) -> (i32, i32) {
    %c0_i32 = arith.constant 0 : i32
    %0 = arith.cmpi eq, %arg1, %c0_i32 : i32
    %c0_i32_0 = arith.constant 0 : i32
    %1 = arith.select %0, %arg2, %c0_i32_0 : i32
    %c0_i32_1 = arith.constant 0 : i32
    %c0_i32_2 = arith.constant 0 : i32
    return %1, %c0_i32_1 : i32, i32
  }
  func.func @transform_2(%arg0: i32, %arg1: i32, %arg2: i32) -> (i32, i32, i32) {
    %c0_i32 = arith.constant 0 : i32
    %c0_i32_0 = arith.constant 0 : i32
    %c0_i32_1 = arith.constant 0 : i32
    %c0_i32_2 = arith.constant 0 : i32
    return %c0_i32, %c0_i32_0, %c0_i32_1 : i32, i32, i32
  }
  func.func @transform_3(%arg0: i32, %arg1: i32, %arg2: i32) -> (i32, i32) {
    %c0_i32 = arith.constant 0 : i32
    return %arg1, %arg2 : i32, i32
  }
  func.func @transform_4(%arg0: i32, %arg1: i32, %arg2: i32) -> (i32, i32, i32) {
    %c0_i32 = arith.constant 0 : i32
    %c0_i32_0 = arith.constant 0 : i32
    %c0_i32_1 = arith.constant 0 : i32
    %c0_i32_2 = arith.constant 0 : i32
    return %c0_i32, %c0_i32_0, %c0_i32_1 : i32, i32, i32
  }
  func.func @transform_5(%arg0: i32, %arg1: i32, %arg2: i32) -> (i32, i32) {
    %c0_i32 = arith.constant 0 : i32
    return %arg0, %arg1 : i32, i32
  }
}

</mosaic_0001>

<bundles_post_ra>
// kernel: tpu_custom_call.1
= control target key start
LH: loop header
LB: loop body
LE: loop exit
PB: predicated region body
PF: predicated region fallthrough
CT: control target
= control target key end

     0   :  { %s1913_s0 = inlined_call_operand.hbm [shape: bf16[16,128], index: 0, kind: input, shape index: {}]   ;;  %s1914_s1 = inlined_call_operand.hbm [shape: bf16[256,128], index: 1, kind: input, shape index: {}]   ;;  %s1915_s2 = inlined_call_operand.vmem [shape: f32[2,1,128], index: 2, kind: input, shape index: {}]   ;;  %s1916_s3 = inlined_call_operand.hbm [shape: bf16[256,256], index: 3, kind: input, shape index: {}]   ;;  %s1917_s4 = inlined_call_operand.vmem [shape: f32[2,1,128], index: 4, kind: input, shape index: {}]   ;;  %s1918_s5 = inlined_call_operand.hbm [shape: f32[16,256], index: 5, kind: output, shape index: {}]  }
   0x1   :  { %1942 = sst [smem:[#allocation32_spill]] %s1913_s0 }
   0x2   :  { %1943 = sst [smem:[#allocation33_spill]] %s1914_s1 }
   0x3   :  { %1944 = sst [smem:[#allocation34_spill]] %s1915_s2 }
   0x4   :  { %1945 = sst [smem:[#allocation35_spill]] %s1916_s3 }
   0x5   :  { %1946 = sst [smem:[#allocation36_spill]] %s1917_s4 }
   0x6   :  { %1947 = sst [smem:[#allocation37_spill]] %s1918_s5 }
   0x7   :  { %10 = vsyncpa [#allocation5], 0 }
   0x8   :  { %12 = vsyncpa [#allocation5 + $0x1], 0 }
   0x9   :  { %13 = vsyncpa [#allocation8], 0 }
   0xa   :  { %15 = vsyncpa [#allocation8 + $0x1], 0 }
   0xb   :  { %16 = vsyncpa [#allocation6], 0 }
   0xc   :  { %18 = vsyncpa [#allocation6 + $0x1], 0  ;;  %s1395_s18 = smov 0   ;;  %s1397_s19 = smov 0  }
   0xd   :  { %s1399_s20 = smov 0   ;;  %s1401_s21 = smov 0  }
   0xe   :  { %s1403_s22 = smov 0   ;;  %s1405_s23 = smov 0  }
   0xf   :  { %s1407_s24 = smov 0   ;;  %s1409_s25 = smov 0  }
  0x10   :  { %s1411_s26 = smov 0   ;;  %s1413_s27 = smov 0  }
  0x11   :  { %s1415_s28 = smov 0   ;;  %s1417_s29 = smov 0  }
  0x12   :  { %s1419_s30 = smov 0   ;;  %s1421_s6 = smov 0  }
  0x13   :  { %s1423_s7 = smov 0   ;;  %s1425_s8 = smov 0  }
  0x14   :  { %s1427_s9 = smov 0   ;;  %s1429_s10 = smov 0  }
  0x15   :  { %s1431_s11 = smov 0  }
  0x16 LB: > { %1948 = sst [smem:[#allocation15_spill]] %s1279_s18  ;;  %s36_s12 = sadd.s32 1, %s1339_s8  ;;  %s1351_s11 = sphi %s1431_s11, %s24_s11   ;;  %s1347_s10 = sphi %s1429_s10, %s2026_s10   ;;  %s1343_s9 = sphi %s1427_s9, %s2037_s9   ;;  %s1339_s8 = sphi %s1425_s8, %s2036_s8   ;;  %s1335_s7 = sphi %s1423_s7, %s2023_s7   ;;  %s1331_s6 = sphi %s1421_s6, %s2035_s6   ;;  %s1327_s30 = sphi %s1419_s30, %s2034_s30   ;;  %s1323_s29 = sphi %s1417_s29, %s2022_s29   ;;  %s1319_s28 = sphi %s1415_s28, %s2033_s28   ;;  %s1315_s27 = sphi %s1413_s27, %s2032_s27   ;;  %s1311_s26 = sphi %s1411_s26, %s2020_s26   ;;  %s1307_s25 = sphi %s1409_s25, %s2031_s25   ;;  %s1303_s24 = sphi %s1407_s24, %s2030_s24   ;;  %s1299_s23 = sphi %s1405_s23, %s2029_s23   ;;  %s1295_s22 = sphi %s1403_s22, %s2028_s22   ;;  %s1291_s21 = sphi %s1401_s21, %s2027_s21   ;;  %s1287_s20 = sphi %s1399_s20, %s2017_s20   ;;  %s1283_s19 = sphi %s1397_s19, %s2016_s19   ;;  %s1279_s18 = sphi %s1395_s18, %s2015_s18  }
  0x17   : > { %1949 = sst [smem:[#allocation16_spill]] %s1283_s19  ;;  %s39_s13 = sadd.s32 1, %s1343_s9 }
  0x18   : > { %1950 = sst [smem:[#allocation17_spill]] %s1287_s20  ;;  %p37_p0 = scmp.ge.s32.totalorder %s36_s12, 2 }
  0x19   : > { %1951 = sst [smem:[#allocation18_spill]] %s1291_s21  ;;  %p1928_p1 = scmp.eq.s32.totalorder %s1351_s11, 0 }
  0x1a   : > { %1952 = sst [smem:[#allocation19_spill]] %s1311_s26  ;;  %p73_p2 = scmp.eq.s32.totalorder %s1343_s9, 0 }
  0x1b   : > { %1953 = sst [smem:[#allocation20_spill]] %s1323_s29  ;;  %s80_s14 = sadd.s32 1, %s1311_s26 }
  0x1c   : > { %1954 = sst [smem:[#allocation21_spill]] %s1327_s30  ;;  %s2039_s12 = smov (%p37_p0, %s36_s12), 0 }
  0x1d   : > { %1955 = sst [smem:[#allocation22_spill]] %s1331_s6  ;;  %s2041_s13 = smov (!%p37_p0, %s39_s13), %s1343_s9 }
  0x1e   : > { %1956 = sst [smem:[#allocation23_spill]] %s1335_s7  ;;  %p41_p3 = scmp.ge.s32.totalorder %s2041_s13, 2 }
  0x1f   : > { %1957 = sst [smem:[#allocation24_spill]] %s1347_s10  ;;  %p87_p4 = scmp.ne.s32.totalorder %s1311_s26, %s1307_s25 }
  0x20   : > { %1958 = sst [smem:[#allocation25_spill]] %s2039_s12  ;;  %p1927_p7 = scmp.lt.s32.totalorder %s1351_s11, 8 }
  0x21   : > { %s74_s15 = scalar_select %p73_p2, %s1339_s8, 0 }
  0x22   : > { %s1509_s16 = scalar_select %p41_p3, 0, %s2041_s13  }
  0x23   : > { %p1513_p6 = por %p87_p4, %p1928_p1  ;;  %s239_s5 = sand.u32 1, %s1351_s11  }
  0x24   : > { %1959 = sst [smem:[#allocation26_spill]] %s1509_s16  ;;  %p75_p8 = scmp.eq.s32.totalorder %s1509_s16, 0 }
  0x25   : > { %s241_s7 = sand.u32 1, %s1311_s26   ;;  %s807_s6 = sshll.u32 %s74_s15, 10 }
  0x26   : > { %s76_s4 = scalar_select %p75_p8, %s2039_s12, 0 }
  0x27   : > { %s767_s2 = sshll.u32 %s241_s7, 6  ;;  %s1961_s1 = sld [smem:[#allocation33_spill]] }
  0x28   : > { %s77_s30 = ssub.s32 %s74_s15, %s76_s4  ;;  %s243_s19 = scalar_lea.vmem [#allocation7], %s767_s2 }
  0x29   : > { %p78_p9 = scmp.eq.s32.totalorder %s77_s30, 0  ;;  %s252_s20 = sshll.u32 %s243_s19, 4  ;;  %s1538_s20 = int_to_ptr.vmem [resolvable:$true] %s252_s20 }
  0x2a   : > { %p1531_p10 = pnand %p1927_p7, %p1513_p6  ;;  %s1540_s0 = scalar_lea.sflag [#allocation8], %s239_s5 }
  0x2b   : > { %s1536_s4 = scalar_select %p78_p9, %s1311_s26, %s80_s14  }
  0x2c   : > { %p1069_p12 = pneg %p1531_p10 }
  0x2d   : > { %s1525_s18 = scalar_lea.hbm %s1961_s1, %s807_s6  ;;  %1963 = sst [smem:[#allocation27_spill]] %s1536_s4 }
  0x2e   : > { %s1067_s3 = scalar_lea.hbm %s1525_s18, 1024  ;;  %s1072_s30 = scalar_lea.hbm %s1961_s1, 2048 }
  0x2f   : > { %p1068_p11 = scmp.ne.s32.totalorder %s1525_s18, %s1067_s3  ;;  %p1073_p2 = scmp.lt.u32.totalorder %s1525_s18, %s1961_s1 }
  0x30   : > { %p1074_p4 = scmp.lt.u32.totalorder %s1072_s30, %s1067_s3  ;;  %p1076_p8 = scmp.lt.u32.totalorder %s1067_s3, %s1525_s18 }
  0x31   : > { %p1070_p13 = pnand %p1069_p12, %p1068_p11 }
  0x32   : > { %p1075_p6 = por %p1074_p4, %p1073_p2 }
  0x33   : > { %p1071_p0 = pneg %p1070_p13 }
  0x34   : > { %p1077_p9 = por %p1076_p8, %p1075_p6 }
  0x36   : > { %p1078_p7 = pnand %p1077_p9, %p1071_p0 }
  0x38   : > { %1081 = shalt.err (!%p1078_p7)
}
  0x39   : > { %s1082_s5 = scalar_lea.vmem %s1538_s20, 1024  ;;  %s1353_s14 = smov [#allocation7]  }
  0x3a   : > { %p1083_p11 = scmp.ne.s32.totalorder %s1538_s20, %s1082_s5  ;;  %s1087_s15 = sshll.u32 %s1353_s14, 4  ;;  %s1088_s15 = int_to_ptr.vmem [resolvable:$false] %s1087_s15 }
  0x3b   : > { %s1089_s17 = scalar_lea.vmem %s1088_s15, 2048  ;;  %p1090_p1 = scmp.lt.s32.totalorder %s1538_s20, %s1088_s15 }
  0x3c   : > { %p1085_p13 = pnand %p1083_p11, %p1069_p12  ;;  %p1091_p2 = scmp.lt.s32.totalorder %s1089_s17, %s1082_s5 }
  0x3e   : > { %p1086_p5 = pneg %p1085_p13  ;;  %p1092_p4 = por %p1091_p2, %p1090_p1 }
  0x40   : > { %p1093_p6 = pnand %p1092_p4, %p1086_p5 }
  0x42   : > { %1096 = shalt.err (!%p1093_p6)
}
  0x43   : > { %s1929_s3 = smov 64   ;;  %s1930_s2 = smov 4  }
  0x44   : > { %881 = dma.hbm_to_vmem [thread:$0]  (!%p1531_p10), %s1525_s18, 1024, %s1538_s20, %s1540_s0, %s1929_s3, %s1929_s3, %s1930_s2  }
  0x45   : > { %p774_p1 = scmp.ge.s32.totalorder %s1351_s11, 1  ;;  %p283_p5 = scmp.lt.s32.totalorder %s1351_s11, 9 }
  0x46   : > { %s1578_s30 = sadd.s32 4294967295, %s1351_s11   ;;  %s43_s18 = sadd.s32 1, %s1347_s10 }
  0x47   : > { %p1573_p7 = pnand %p774_p1, %p283_p5  ;;  %s2043_s18 = smov (!%p41_p3, %s43_s18), %s1347_s10 }
  0x48   : > { %s50_s20 = sadd.s32 1, %s1323_s29  ;;  %p57_p10 = scmp.ne.s32.totalorder %s1323_s29, %s1319_s28 }
  0x49   : > { %s1964_s19 = scalar_select %p1573_p7, 1, 0 }
  0x4a   : > { %p45_p12 = scmp.ge.s32.totalorder %s2043_s18, 2  ;;  %s1965_s6 = sld [smem:[#allocation18_spill]] }
  0x4b   : > { %p63_p0 = scmp.ne.s32.totalorder %s1319_s28, %s1315_s27  ;;  %p1966_p8 = scmp.eq.s32.totalorder %s1351_s11, 0 }
  0x4c   : > { %p64_p11 = scmp.eq.s32.totalorder %s1578_s30, 0  ;;  %s2045_s18 = smov (%p45_p12, %s2043_s18), 0 }
  0x4d   : > { %p1592_p9 = por %p1966_p8, %p57_p10  ;;  %1968 = sst [smem:[#allocation28_spill]] %s2045_s18 }
  0x4e   : > { %s1969_s13 = smov %s2045_s18  ;;  %p1601_p3 = por %p64_p11, %p63_p0 }
  0x4f   : > { %p1971_p13 = scmp.ne.s32.totalorder %s1307_s25, %s1303_s24  ;;  %s1973_s14 = sld [smem:[#allocation17_spill]] }
  0x50   : > { %s1970_s5 = scalar_select %p1601_p3, 1, 0 }
  0x51   : > { %p1610_p2 = por %p1971_p13, %p64_p11  ;;  %s47_s15 = ssub.s32 %s1347_s10, %s1969_s13 }
  0x52   : > { %s1974_s17 = sld [smem:[#allocation16_spill]]  ;;  %s124_s3 = ssub.s32 %s1343_s9, %s1509_s16 }
  0x53   : > { %s1972_s27 = scalar_select %p1610_p2, 1, 0 }
  0x54   : > { %p48_p4 = scmp.eq.s32.totalorder %s47_s15, 0  ;;  %s125_s18 = ssub.s32 %s1339_s8, %s2039_s12 }
  0x55   : > { %s126_s2 = sor.u32 %s125_s18, %s124_s3  ;;  %s1975_s21 = sld [smem:[#allocation15_spill]] }
  0x56   : > { %s129_s1 = sadd.s32 1, %s1299_s23  ;;  %p127_p6 = scmp.eq.s32.totalorder %s126_s2, 0 }
  0x57   : > { %s1622_s4 = scalar_select %p48_p4, %s1323_s29, %s50_s20  }
  0x58   : > { %p136_p1 = scmp.ne.s32.totalorder %s1299_s23, %s1295_s22  ;;  %p142_p5 = scmp.ne.s32.totalorder %s1295_s22, %s1965_s6 }
  0x59   : > { %1976 = sst [smem:[#allocation29_spill]] %s1622_s4  ;;  %s175_s24 = sor.u32 %s124_s3, %s47_s15 }
  0x5a   : > { %s1629_s13 = scalar_select %p127_p6, %s1299_s23, %s129_s1  }
  0x5b   : > { %p1978_p10 = pmov %p1966_p8  ;;  %p1639_p0 = por %p142_p5, %p64_p11 }
  0x5c   : > { %1977 = sst [smem:[#allocation30_spill]] %s1629_s13  ;;  %p176_p8 = scmp.eq.s32.totalorder %s175_s24, 0 }
  0x5d   : > { %p1633_p12 = por %p136_p1, %p1978_p10  ;;  %s178_s2 = sadd.s32 1, %s1973_s14 }
  0x5e   : > { %s1980_s18 = scalar_select %p1639_p0, 1, 0 }
  0x5f   : > { %p188_p13 = scmp.ne.s32.totalorder %s1973_s14, %s1974_s17  ;;  %p189_p4 = scmp.eq.s32.totalorder %s1578_s30, 7 }
  0x60   : > { %s2047_s14 = smov (!%p176_p8, %s1973_s14), %s178_s2  ;;  %p194_p1 = scmp.ne.s32.totalorder %s1974_s17, %s1975_s21 }
  0x61   : > { %1981 = sst [smem:[#allocation31_spill]] %s2047_s14  ;;  %p1650_p6 = por %p189_p4, %p188_p13 }
  0x62   : > { %s1983_s3 = sadd.s32 4294967294, %s1351_s11   ;;  %s221_s20 = sand.u32 1, %s1323_s29  }
  0x63   : > { %s1982_s1 = scalar_select %p1650_p6, 1, 0 }
  0x64   : > { %p195_p11 = scmp.eq.s32.totalorder %s1983_s3, 7  ;;  %s765_s6 = sshll.u32 %s221_s20, 2 }
  0x65   : > { %s766_s24 = sshll.u32 %s1347_s10, 6  ;;  %s225_s12 = scalar_lea.vmem [#allocation4], %s765_s6 }
  0x66   : > { %p1659_p5 = por %p195_p11, %p194_p1  ;;  %s232_s4 = sshll.u32 %s225_s12, 4  ;;  %s1669_s4 = int_to_ptr.vmem [resolvable:$true] %s232_s4 }
  0x67   : > { %s1985_s2 = sld [smem:[#allocation32_spill]]  ;;  %p1986_p10 = scmp.lt.s32.totalorder %s1351_s11, 8 }
  0x68   : > { %s1984_s15 = scalar_select %p1659_p5, 1, 0 }
  0x69   : > { %p1675_p8 = pnand %p1986_p10, %p1592_p9  ;;  %s264_s12 = sand.u32 1, %s1299_s23  }
  0x6a   : > { %s1680_s17 = sshll.u32 %s264_s12, 6  ;;  %s808_s26 = sshll.u32 %s1343_s9, 5 }
  0x6b   : > { %s222_s13 = scalar_lea.sflag [#allocation5], %s221_s20  ;;  %p1099_p4 = pneg %p1675_p8 }
  0x6d   : > { %s1667_s14 = scalar_lea.hbm %s1985_s2, %s766_s24  ;;  %s1102_s24 = scalar_lea.hbm %s1985_s2, 128 }
  0x6e   : > { %s1097_s3 = scalar_lea.hbm %s1667_s14, 64  ;;  %p1103_p9 = scmp.lt.u32.totalorder %s1667_s14, %s1985_s2 }
  0x6f   : > { %p1098_p13 = scmp.ne.s32.totalorder %s1667_s14, %s1097_s3  ;;  %p1104_p10 = scmp.lt.u32.totalorder %s1102_s24, %s1097_s3 }
  0x70   : > { %p1106_p6 = scmp.lt.u32.totalorder %s1097_s3, %s1667_s14 }
  0x71   : > { %p1100_p1 = pnand %p1099_p4, %p1098_p13  ;;  %p1105_p5 = por %p1104_p10, %p1103_p9 }
  0x73   : > { %p1101_p11 = pneg %p1100_p1  ;;  %p1107_p0 = por %p1106_p6, %p1105_p5 }
  0x75   : > { %p1108_p2 = pnand %p1107_p0, %p1101_p11 }
  0x77   : > { %1111 = shalt.err (!%p1108_p2)
}
  0x78   : > { %s1112_s20 = scalar_lea.vmem %s1669_s4, 64  ;;  %s1356_s12 = smov [#allocation4]  }
  0x79   : > { %p1113_p13 = scmp.ne.s32.totalorder %s1669_s4, %s1112_s20  ;;  %s1117_s7 = sshll.u32 %s1356_s12, 4  ;;  %s1118_s7 = int_to_ptr.vmem [resolvable:$false] %s1117_s7 }
  0x7a   : > { %s1119_s29 = scalar_lea.vmem %s1118_s7, 128  ;;  %p1120_p7 = scmp.lt.s32.totalorder %s1669_s4, %s1118_s7 }
  0x7b   : > { %p1115_p1 = pnand %p1113_p13, %p1099_p4  ;;  %p1121_p9 = scmp.lt.s32.totalorder %s1119_s29, %s1112_s20 }
  0x7d   : > { %p1116_p3 = pneg %p1115_p1  ;;  %p1122_p10 = por %p1121_p9, %p1120_p7 }
  0x7f   : > { %p1123_p6 = pnand %p1122_p10, %p1116_p3 }
  0x81   : > { %1126 = shalt.err (!%p1123_p6)
}
  0x82   : > { %878 = dma.hbm_to_vmem [thread:$0]  (!%p1675_p8), %s1667_s14, 64, %s1669_s4, %s222_s13  }
  0x83   : > { %s272_s10 = sadd.s32 %s1339_s8, %s808_s26  ;;  %s266_s3 = scalar_lea.vmem [#allocation9], %s1680_s17 }
  0x84   : > { %s275_s6 = sshll.u32 %s266_s3, 4  ;;  %s773_s24 = sshll.u32 %s272_s10, 6  ;;  %s1712_s6 = int_to_ptr.vmem [resolvable:$true] %s275_s6 }
  0x85   : > { %s1988_s7 = sld [smem:[#allocation35_spill]]  ;;  %p1990_p7 = scmp.lt.s32.totalorder %s1351_s11, 8 }
  0x87   : > { %p1723_p3 = pnand %p1990_p7, %p1633_p12 }
  0x89   : > { %p1129_p0 = pneg %p1723_p3 }
  0x8b   : > { %s1989_s2 = smov %s1988_s7  ;;  %s1717_s29 = scalar_lea.hbm %s1988_s7, %s773_s24 }
  0x8c   : > { %s1127_s14 = scalar_lea.hbm %s1717_s29, 1024  ;;  %s1132_s17 = scalar_lea.hbm %s1989_s2, 4096 }
  0x8d   : > { %p1128_p2 = scmp.ne.s32.totalorder %s1717_s29, %s1127_s14  ;;  %p1133_p12 = scmp.lt.u32.totalorder %s1717_s29, %s1989_s2 }
  0x8e   : > { %p1134_p4 = scmp.lt.u32.totalorder %s1132_s17, %s1127_s14  ;;  %p1136_p13 = scmp.lt.u32.totalorder %s1127_s14, %s1717_s29 }
  0x8f   : > { %p1130_p5 = pnand %p1129_p0, %p1128_p2 }
  0x90   : > { %p1135_p11 = por %p1134_p4, %p1133_p12 }
  0x91   : > { %p1131_p8 = pneg %p1130_p5 }
  0x92   : > { %p1137_p1 = por %p1136_p13, %p1135_p11 }
  0x94   : > { %p1138_p9 = pnand %p1137_p1, %p1131_p8 }
  0x96   : > { %1141 = shalt.err (!%p1138_p9)
}
  0x97   : > { %s1142_s10 = scalar_lea.vmem %s1712_s6, 1024  ;;  %s1357_s3 = smov [#allocation9]  }
  0x98   : > { %p1143_p10 = scmp.ne.s32.totalorder %s1712_s6, %s1142_s10  ;;  %s1147_s24 = sshll.u32 %s1357_s3, 4  ;;  %s1148_s24 = int_to_ptr.vmem [resolvable:$false] %s1147_s24 }
  0x99   : > { %s1149_s20 = scalar_lea.vmem %s1148_s24, 2048  ;;  %p1150_p2 = scmp.lt.s32.totalorder %s1712_s6, %s1148_s24 }
  0x9a   : > { %p1145_p6 = pnand %p1143_p10, %p1129_p0  ;;  %p1151_p5 = scmp.lt.s32.totalorder %s1149_s20, %s1142_s10 }
  0x9c   : > { %p1146_p7 = pneg %p1145_p6  ;;  %p1152_p12 = por %p1151_p5, %p1150_p2 }
  0x9e   : > { %p1153_p4 = pnand %p1152_p12, %p1146_p7 }
  0xa0   : > { %1156 = shalt.err (!%p1153_p4)
}
  0xa1   : > { %s1358_s12 = smov 128   ;;  %s1992_s7 = smov 4  }
  0xa2   : > { %s1993_s14 = smov 64   ;;  %p1994_p0 = scmp.ne.s32.totalorder %s1964_s19, 0 }
  0xa3   : > { %884 = dma.hbm_to_vmem [thread:$0]  (!%p1723_p3), %s1717_s29, 1024, %s1712_s6, %s1540_s0, %s1358_s12, %s1993_s14, %s1992_s7  }
  0xa4   : > { %287 = sbr.rel (%p1994_p0) target bundleno = 806 (0x326), region = 40  ;;  %s289_s16 = sand.u32 (!%p1994_p0), 1, %s1319_s28  }
  0xa5   : > { %s1758_s21 = sshll.u32 (!%p1994_p0), %s289_s16, 2  ;;  %s290_s17 = scalar_lea.sflag (!%p1994_p0), [#allocation5], %s289_s16 }
  0xa6   : > { %s293_s26 = scalar_lea.vmem (!%p1994_p0), [#allocation4], %s1758_s21  ;;  %p1995_p8 = scmp.ne.s32.totalorder (!%p1994_p0), %s1970_s5, 0 }
  0xab   : > { %1262 = dma.done.wait (%p1995_p8), %s290_s17, 64  }
  0xac   : > { %1264 = vsyncadd (%p1995_p8), %s290_s17, 4294967232  ;;  %s298_s0 = sand.u32 1, %s1578_s30   ;;  %s300_s6 = sand.u32 1, %s1307_s25  }
  0xad   : > { %s776_s19 = sshll.u32 %s300_s6, 6  ;;  %s299_s29 = scalar_lea.sflag [#allocation8], %s298_s0 }
  0xae   : > { %s1767_s4 = scalar_lea.vmem [#allocation7], %s776_s19  ;;  %p1996_p3 = scmp.ne.s32.totalorder %s1972_s27, 0 }
  0xb0   : > { %1266 = dma.done.wait (%p1996_p3), %s299_s29, 1024  }
  0xb1   : > { %1268 = vsyncadd (%p1996_p3), %s299_s29, 4294966272  ;;  %s309_s13 = sand.u32 1, %s1295_s22   ;;  %p1997_p11 = scmp.ne.s32.totalorder %s1980_s18, 0 }
  0xb2   : > { %s777_s10 = sshll.u32 %s309_s13, 6 }
  0xb3   : > { %s1774_s5 = scalar_lea.vmem [#allocation9], %s777_s10 }
  0xb4   : > { %1270 = dma.done.wait (%p1997_p11), %s299_s29, 1024  }
  0xb5   : > { %1272 = vsyncadd (%p1997_p11), %s299_s29, 4294966272  ;;  %s1998_s30 = sld [smem:[#allocation16_spill]]  ;;  %s1999_s20 = sld [smem:[#allocation21_spill]] }
  0xbb   : > { %s345_s3 = sand.u32 1, %s1998_s30   ;;  %p779_p13 = scmp.ne.s32.totalorder %s1999_s20, 0 }
  0xbc   : > { %s1783_s24 = sshll.u32 %s345_s3, 3  ;;  %v1359_v0 = vmov (!%p779_p13), 0.0  }
  0xbd   : > { %s347_s27 = scalar_lea.vmem [#allocation10], %s1783_s24  ;;  %356 = sbr.rel (%p779_p13) target bundleno = 196 (0xc4), region = 56  ;;  %357 = vst [vmem:[#allocation2] sm:$0xff] (!%p779_p13), %v1359_v0 }
  0xc4 PF: > { %s2000_s12 = sld [smem:[#allocation22_spill]] }
  0xca   : > { %p780_p1 = scmp.ne.s32.totalorder %s2000_s12, 0 }
  0xcb   : > { %v1051_v1 = vld [vmem:[%s1767_s4] sm:$0xff] (!%p780_p1)   ;;  %v1360_v2 = vmov (!%p780_p1), 0.0   ;;  %vm1361_vm0 = vmmov (!%p780_p1), 0   ;;  %v1052_v3 = vld [vmem:[%s1767_s4 + $0x8] sm:$0xff] (!%p780_p1)   ;;  %v1053_v4 = vld [vmem:[%s1767_s4 + $0x10] sm:$0xff] (!%p780_p1)   ;;  %s2001_s18 = sld [smem:[#allocation21_spill]] (!%p780_p1) }
  0xcc   : > { %361 = sbr.rel (%p780_p1) target bundleno = 487 (0x1e7), region = 60  ;;  %827 = vmatprep.subr.bf16.mxu0 (!%p780_p1), %v1360_v2  ;;  %843 = vmatprep.mubr.msk.bf16.mxu0 (!%p780_p1), %vm1361_vm0, %v1360_v2  ;;  %v1054_v5 = vld [vmem:[%s1767_s4 + $0x18] sm:$0xff] (!%p780_p1)   ;;  %v1055_v6 = vld [vmem:[%s1767_s4 + $0x20] sm:$0xff] (!%p780_p1)   ;;  %v1056_v7 = vld [vmem:[%s1767_s4 + $0x28] sm:$0xff] (!%p780_p1)   ;;  %s2002_s16 = sld [smem:[#allocation34_spill]] (!%p780_p1) }
  0xcd   : > { %828 = vmatpush3.bf16.xpose.msra.mxu0 (!%p780_p1), %v1051_v1  ;;  %v1057_v8 = vld [vmem:[%s1767_s4 + $0x30] sm:$0xff] (!%p780_p1)   ;;  %v1058_v9 = vld [vmem:[%s1767_s4 + $0x38] sm:$0xff] (!%p780_p1)  }
  0xce   : > { %829 = vmatprep.subr.bf16.mxu0 (!%p780_p1), %v1360_v2  ;;  %v362_v10 = vld [vmem:[%s293_s26] sm:$0xf] (!%p780_p1) }
  0xd1   : > { %s790_s0 = sshll.u32 (!%p780_p1), %s2001_s18, 2 }
  0xd2   : > { %s379_s17 = scalar_lea.vmem (!%p780_p1), %s2002_s16, %s2001_s18  ;;  %s478_s6 = scalar_lea.vmem (!%p780_p1), [#allocation3], %s790_s0 }
  0xd3   : > { %v781_v11 = vld [vmem:[%s379_s17] ss:$0 sm:$0xff] }
  0xd5   : > { %830 = vmatpush3.bf16.xpose.msra.mxu0 %v1052_v3 }
  0xd6   : > { %831 = vmatprep.subr.bf16.mxu0 %v1360_v2 }
  0xdd   : > { %832 = vmatpush3.bf16.xpose.msra.mxu0 %v1053_v4 }
  0xde   : > { %833 = vmatprep.subr.bf16.mxu0 %v1360_v2 }
  0xe5   : > { %834 = vmatpush3.bf16.xpose.msra.mxu0 %v1054_v5 }
  0xe6   : > { %835 = vmatprep.subr.bf16.mxu0 %v1360_v2 }
  0xed   : > { %836 = vmatpush3.bf16.xpose.msra.mxu0 %v1055_v6 }
  0xee   : > { %837 = vmatprep.subr.bf16.mxu0 %v1360_v2 }
  0xf5   : > { %838 = vmatpush3.bf16.xpose.msra.mxu0 %v1056_v7 }
  0xf6   : > { %839 = vmatprep.subr.bf16.mxu0 %v1360_v2 }
  0xfd   : > { %840 = vmatpush3.bf16.xpose.msra.mxu0 %v1057_v8 }
  0xfe   : > { %841 = vmatprep.subr.bf16.mxu0 %v1360_v2 }
 0x105   : > { %842 = vmatpush3.bf16.xpose.msra.mxu0 %v1058_v9 }
 0x10c   : > { %844 = vmatmul.mubr.bf16.vlgmr.msra.gmra.mrb[0].mxu0 %v362_v10 }
 0x1df   : > { %v469_v12 = vpop.f32.mrb[0].mxu0 }
 0x1e0   : > { %v470_v13 = vadd.f32 %v781_v11, %v469_v12  ;;  %v845_v14 = vpop.f32.mrb[1].mxu0 }
 0x1e1   : > { %v472_v15 = vpop.f32.mrb[2].mxu0 }
 0x1e2   : > { %v475_v16 = vmax.f32 %v470_v13, 0.0  ;;  %v846_v17 = vpop.f32.mrb[3].mxu0 }
 0x1e4   : > { %v476_v18 = vpack.c.bf16 %v475_v16, %v475_v16 }
 0x1e6   : > { %479 = vst [vmem:[%s478_s6] sm:$0xf] %v476_v18 }
 0x1e7 PF: > { %v1059_v19 = vld [vmem:[%s1774_s5] sm:$0xff]   ;;  %v1362_v20 = vmov 0.0   ;;  %vm1363_vm1 = vmmov 0   ;;  %v1060_v21 = vld [vmem:[%s1774_s5 + $0x8] sm:$0xff]   ;;  %v1061_v22 = vld [vmem:[%s1774_s5 + $0x10] sm:$0xff]   ;;  %s2003_s21 = sld [smem:[#allocation21_spill]] }
 0x1e8   : > { %847 = vmatprep.subr.bf16.mxu0 %v1362_v20  ;;  %863 = vmatprep.mubr.msk.bf16.mxu0 %vm1363_vm1, %v1362_v20  ;;  %v1062_v23 = vld [vmem:[%s1774_s5 + $0x18] sm:$0xff]   ;;  %v1063_v24 = vld [vmem:[%s1774_s5 + $0x20] sm:$0xff]   ;;  %v1064_v25 = vld [vmem:[%s1774_s5 + $0x28] sm:$0xff]  }
 0x1e9   : > { %848 = vmatpush3.bf16.xpose.msra.mxu0 %v1059_v19  ;;  %v1065_v26 = vld [vmem:[%s1774_s5 + $0x30] sm:$0xff]   ;;  %v1066_v27 = vld [vmem:[%s1774_s5 + $0x38] sm:$0xff]   ;;  %v480_v29 = vld [vmem:[#allocation2] sm:$0xff] }
 0x1ea   : > { %849 = vmatprep.subr.bf16.mxu0 %v1362_v20 }
 0x1ed   : > { %s791_s26 = sshll.u32 %s2003_s21, 2  ;;  %p800_p9 = scmp.ne.s32.totalorder %s2003_s21, 1 }
 0x1ee   : > { %s482_s19 = scalar_lea.vmem [#allocation3], %s791_s26  ;;  %s2004_s29 = sld [smem:[#allocation22_spill]] (!%p800_p9) }
 0x1ef   : > { %v483_v28 = vld [vmem:[%s482_s19] sm:$0xf]  ;;  %s2005_s10 = sld [smem:[#allocation36_spill]] (!%p800_p9) }
 0x1f1   : > { %850 = vmatpush3.bf16.xpose.msra.mxu0 %v1060_v21 }
 0x1f2   : > { %851 = vmatprep.subr.bf16.mxu0 %v1362_v20 }
 0x1f5   : > { %s595_s5 = scalar_lea.vmem (!%p800_p9), %s2005_s10, %s2004_s29 }
 0x1f6   : > { %v801_v36 = vld [vmem:[%s595_s5] ss:$0 sm:$0xff] (!%p800_p9) }
 0x1f9   : > { %852 = vmatpush3.bf16.xpose.msra.mxu0 %v1061_v22 }
 0x1fa   : > { %853 = vmatprep.subr.bf16.mxu0 %v1362_v20 }
 0x201   : > { %854 = vmatpush3.bf16.xpose.msra.mxu0 %v1062_v23 }
 0x202   : > { %855 = vmatprep.subr.bf16.mxu0 %v1362_v20 }
 0x209   : > { %856 = vmatpush3.bf16.xpose.msra.mxu0 %v1063_v24 }
 0x20a   : > { %857 = vmatprep.subr.bf16.mxu0 %v1362_v20 }
 0x211   : > { %858 = vmatpush3.bf16.xpose.msra.mxu0 %v1064_v25 }
 0x212   : > { %859 = vmatprep.subr.bf16.mxu0 %v1362_v20 }
 0x219   : > { %860 = vmatpush3.bf16.xpose.msra.mxu0 %v1065_v26 }
 0x21a   : > { %861 = vmatprep.subr.bf16.mxu0 %v1362_v20 }
 0x221   : > { %862 = vmatpush3.bf16.xpose.msra.mxu0 %v1066_v27 }
 0x228   : > { %864 = vmatmul.mubr.bf16.vlgmr.msra.gmra.mrb[0].mxu0 %v483_v28 }
 0x2f8   : > { %593 = sbr.rel (%p800_p9) target bundleno = 777 (0x309), region = 64 }
 0x2fb   : > { %v582_v30 = vpop.f32.mrb[0].mxu0 }
 0x2fc   : > { %v588_v31 = vadd.f32 %v582_v30, %v480_v29  ;;  %v865_v32 = vpop.f32.mrb[1].mxu0 }
 0x2fd   : > { %v585_v33 = vpop.f32.mrb[2].mxu0 }
 0x2fe   : > { %589 = vst [vmem:[#allocation2] sm:$0xff] %v588_v31  ;;  %v866_v34 = vpop.f32.mrb[3].mxu0 }
 0x305   : > { %v594_v35 = vld [vmem:[#allocation2] sm:$0xff] }
 0x306   : > { %v603_v37 = vadd.f32 %v801_v36, %v594_v35 }
 0x308   : > { %604 = vst [vmem:[%s347_s27] sm:$0xff] %v603_v37 }
 0x309 PF: > { %s2006_s30 = sld [smem:[#allocation23_spill]]  ;;  %s2007_s20 = sld [smem:[#allocation22_spill]] }
 0x30a   : > { %s621_s14 = sshll.u32 %s347_s27, 4  ;;  %s2009_s6 = sld [smem:[#allocation37_spill]]  ;;  %s1823_s14 = int_to_ptr.vmem [resolvable:$true] %s621_s14 }
 0x30b   : > { %s606_s26 = scalar_lea.sflag [#allocation6], %s345_s3  ;;  %s1157_s19 = scalar_lea.vmem %s1823_s14, 128 }
 0x30c   : > { %p1158_p10 = scmp.ne.s32.totalorder %s1823_s14, %s1157_s19  ;;  %p2011_p6 = scmp.ne.s32.totalorder %s1982_s1, 0 }
 0x30d   : > { %s1364_s29 = smov [#allocation10]  }
 0x30e   : > { %p1159_p7 = pnand %p1158_p10, %p2011_p6  ;;  %s1161_s24 = sshll.u32 %s1364_s29, 4  ;;  %s1162_s24 = int_to_ptr.vmem [resolvable:$false] %s1161_s24 }
 0x30f   : > { %s803_s18 = sshll.u32 %s2006_s30, 1  ;;  %s1163_s27 = scalar_lea.vmem %s1162_s24, 256 }
 0x310   : > { %s617_s7 = sadd.s32 %s2007_s20, %s803_s18  ;;  %s2010_s4 = smov %s2009_s6 }
 0x311   : > { %s804_s16 = sshll.u32 %s617_s7, 7  ;;  %p1160_p2 = pneg %p1159_p7 }
 0x312   : > { %s619_s21 = scalar_lea.hbm %s2009_s6, %s804_s16  ;;  %p1164_p5 = scmp.lt.s32.totalorder %s1823_s14, %s1162_s24 }
 0x313   : > { %p1165_p12 = scmp.lt.s32.totalorder %s1163_s27, %s1157_s19 }
 0x315   : > { %p1166_p4 = por %p1165_p12, %p1164_p5 }
 0x317   : > { %p1167_p0 = pnand %p1166_p4, %p1160_p2 }
 0x319   : > { %1170 = shalt.err (!%p1167_p0)
}
 0x31a   : > { %s1171_s13 = scalar_lea.hbm %s619_s21, 128  ;;  %s1175_s5 = scalar_lea.hbm %s2010_s4, 512 }
 0x31b   : > { %p1172_p8 = scmp.ne.s32.totalorder %s619_s21, %s1171_s13  ;;  %p1176_p13 = scmp.lt.u32.totalorder %s619_s21, %s2010_s4 }
 0x31c   : > { %p1177_p1 = scmp.lt.u32.totalorder %s1175_s5, %s1171_s13  ;;  %p1179_p10 = scmp.lt.u32.totalorder %s1171_s13, %s619_s21 }
 0x31d   : > { %p1173_p3 = pnand %p1172_p8, %p2011_p6 }
 0x31e   : > { %p1178_p9 = por %p1177_p1, %p1176_p13 }
 0x31f   : > { %p1174_p11 = pneg %p1173_p3 }
 0x320   : > { %p1180_p7 = por %p1179_p10, %p1178_p9 }
 0x322   : > { %p1181_p2 = pnand %p1180_p7, %p1174_p11 }
 0x324   : > { %1184 = shalt.err (!%p1181_p2)
}
 0x325   : > { %873 = dma.vmem_to_hbm [thread:$0]  (%p2011_p6), %s1823_s14, 128, %s619_s21, %s606_s26  }
 0x326 PF: > { %s2012_s12 = sld [smem:[#allocation15_spill]]  ;;  %p890_p5 = scmp.ge.s32.totalorder %s1351_s11, 2 }
 0x327   : > { %p2013_p12 = scmp.ne.s32.totalorder %s1984_s15, 0 }
 0x329   : > { %p886_p4 = pnand %p890_p5, %p2013_p12 }
 0x32c   : > { %s633_s18 = sand.u32 1, %s2012_s12  }
 0x32d   : > { %s634_s7 = scalar_lea.sflag [#allocation6], %s633_s18 }
 0x32e   : > { %1274 = dma.done.wait (!%p886_p4), %s634_s7, 128  }
 0x32f   : > { %1276 = vsyncadd (!%p886_p4), %s634_s7, 4294967168  ;;  %s24_s11 = sadd.s32 1, %s1351_s11   ;;  %s2015_s18 = sld [smem:[#allocation16_spill]] }
 0x330   : > { %p1851_p0 = scmp.ge.s32.totalorder %s24_s11, 10   ;;  %s2016_s19 = sld [smem:[#allocation17_spill]] }
 0x331   : > { %s2017_s20 = sld [smem:[#allocation31_spill]]  ;;  %s2018_s1 = sld [smem:[#allocation30_spill]] }
 0x332   : > { %s2019_s14 = sld [smem:[#allocation19_spill]]  ;;  %s2020_s26 = sld [smem:[#allocation27_spill]] }
 0x333   : > { %s2021_s15 = sld [smem:[#allocation20_spill]]  ;;  %s2022_s29 = sld [smem:[#allocation29_spill]] }
 0x334   : > { %s2023_s7 = sld [smem:[#allocation24_spill]]  ;;  %s2024_s17 = sld [smem:[#allocation25_spill]] }
 0x335   : > { %s2025_s0 = sld [smem:[#allocation26_spill]]  ;;  %s2026_s10 = sld [smem:[#allocation28_spill]] }
 0x336   : > { %s2027_s21 = smov %s1295_s22  ;;  %s2028_s22 = smov %s1299_s23 }
 0x337   : > { %s2029_s23 = smov %s2018_s1  ;;  %s2030_s24 = smov %s1307_s25 }
 0x338   : > { %s2031_s25 = smov %s2019_s14  ;;  %s2032_s27 = smov %s1319_s28 }
 0x339   : > { %s2033_s28 = smov %s2021_s15  ;;  %s2034_s30 = smov %s1339_s8 }
 0x33a   : > { %s2035_s6 = smov %s1343_s9  ;;  %s2036_s8 = smov %s2024_s17 }
 0x33b   : > { %s2037_s9 = smov %s2025_s0  ;;  %23 = sbr.rel (!%p1851_p0) target bundleno = 22 (0x16), region = 125 }
 0x342   :  { %639 = vsyncpa [#allocation5], 1 }
 0x343   :  { %641 = vsyncpa [#allocation5 + $0x1], 1 }
 0x344   :  { %642 = vsyncpa [#allocation8], 1 }
 0x345   :  { %644 = vsyncpa [#allocation8 + $0x1], 1 }
 0x346   :  { %645 = vsyncpa [#allocation6], 1 }
 0x347   :  { %647 = vsyncpa [#allocation6 + $0x1], 1 }

</bundles_post_ra>
